<compile_context>
chip_gen: v6e
topology: v6e:2x2x1
jax: 0.10.0
libtpu: 0.0.40
codegen_flags: <defaults>
</compile_context>

<pallas_src>
import jax
import jax.numpy as jnp
from jax.experimental import pallas as pl
from jax.experimental.pallas import tpu as pltpu

EPS = 1e-5      # PyTorch BatchNorm1d default eps
LANE = 128      # TPU lane width
_TM_CANDIDATES = (512, 256, 128, 64, 32, 16, 8)


def _round_up(a, b):
    return ((a + b - 1) // b) * b


# ---------------------------------------------------------------------------
# Kernels
# ---------------------------------------------------------------------------
def _ff_kernel(x_ref, w1_ref, b1_ref, w2_ref, b2_ref, o_ref):
    """Resident-weight fast path: all of W1/W2 live in VMEM, single row-tile grid."""
    # f32 -> bf16 cast in-kernel (VPU work hidden under MXU pushes).
    x = x_ref[...].astype(w1_ref.dtype)
    # First linear (BN eval-stats + b1 pre-folded into w1/b1): (tm, D) @ (D, H).
    h = jnp.dot(x, w1_ref[...], preferred_element_type=jnp.float32)
    # Bias + ReLU epilogue in f32 (safe on v5e VPU).  Dropout is identity at eval.
    h = jnp.maximum(h + b1_ref[...], 0.0)
    # Second linear to a lane-dense (128-padded) output slab: (tm, H) @ (H, Np).
    y = jnp.dot(h.astype(w2_ref.dtype), w2_ref[...],
                preferred_element_type=jnp.float32)
    o_ref[...] = (y + b2_ref[...]).astype(o_ref.dtype)


def _ff_kernel_htiled(x_ref, w1_ref, b1_ref, w2_ref, b2_ref, o_ref, acc_ref):
    """Fallback: hidden dim tiled over grid axis 1 with an f32 accumulator.

    Exact because ReLU is elementwise per hidden unit, so
      y = sum_k relu(x @ W1[:, k] + b1[k]) @ W2[k, :].
    """
    k = pl.program_id(1)

    @pl.when(k == 0)
    def _():
        acc_ref[...] = jnp.zeros_like(acc_ref)

    x = x_ref[...].astype(w1_ref.dtype)
    h = jnp.dot(x, w1_ref[...], preferred_element_type=jnp.float32)
    h = jnp.maximum(h + b1_ref[...], 0.0)
    acc_ref[...] += jnp.dot(h.astype(w2_ref.dtype), w2_ref[...],
                            preferred_element_type=jnp.float32)

    @pl.when(k == pl.num_programs(1) - 1)
    def _():
        o_ref[...] = (acc_ref[...] + b2_ref[...]).astype(o_ref.dtype)


# ---------------------------------------------------------------------------
# Weight preparation (done ONCE when weights are loaded, not per call)
# ---------------------------------------------------------------------------
def prepare_params(params, *, compute_dtype=jnp.bfloat16):
    """Fold eval-mode BatchNorm into W1/b1, pad output dim to lane width, cast."""
    scale = params["gamma"] * jax.lax.rsqrt(params["running_var"] + EPS)  # (1, H)
    w1 = params["w1"] * scale                                             # column-wise
    b1 = (params["b1"] - params["running_mean"]) * scale + params["beta"]

    w2, b2 = params["w2"], params["b2"]
    out_dim = w2.shape[1]
    n_pad = _round_up(out_dim, LANE)
    if n_pad != out_dim:
        w2 = jnp.pad(w2, ((0, 0), (0, n_pad - out_dim)))
        b2 = jnp.pad(b2, ((0, 0), (0, n_pad - out_dim)))

    # TODO(synk): fp8 (v7x) / int8 (v5e,v6e) weight quantization with per-column
    # scales folded into the f32 epilogue is the next lever for weight-DMA-bound
    # small-batch calls; left at bf16 for accuracy here.
    return {
        "w1": w1.astype(compute_dtype),        # (D, H)   MXU operand
        "b1": b1.astype(jnp.float32),          # (1, H)   f32 epilogue
        "w2": w2.astype(compute_dtype),        # (H, Np)  MXU operand
        "b2": b2.astype(jnp.float32),          # (1, Np)  f32 epilogue
        "out_dim": out_dim,
    }


# ---------------------------------------------------------------------------
# Tiling / budget helpers
# ---------------------------------------------------------------------------
def _vmem_cap():
    """Generation-aware scoped-VMEM cap: ~48 MiB on v7x, ~96 MiB on v5e/v6e."""
    try:
        phys = int(pltpu.get_tpu_info().vmem_capacity_bytes)
    except Exception:
        phys = 64 << 20            # conservative (v7x-sized) fallback
    return max(32 << 20, (phys * 3) // 4)


def _pick_tm(B, tm_max):
    """Row tile minimizing last-tile padding, with >=2 grid steps when B>=16."""
    B8 = _round_up(B, 8)
    best = 8
    for t in _TM_CANDIDATES:
        if t > tm_max:
            continue
        b_pad = _round_up(B8, t)
        if (b_pad - B) / b_pad <= 0.125:   # accept <=12.5% padded-row waste
            best = t
            break
    b_pad = _round_up(B8, best)
    # >=2 steps on the "parallel" axis so both v7x TensorCores get work
    # (costs only ~0.35us/step on 1-TC v5e/v6e).
    if b_pad // best < 2 and B8 >= 16:
        best = max(8, _round_up(b_pad // 2, 8))
        while b_pad % best:
            best -= 8
        b_pad = _round_up(B8, best)
    return best, b_pad


def _pick_th(D, H, Np, itm, cap):
    """Largest 128-multiple divisor of H whose double-buffered weight chunk fits."""
    if H % 128 != 0:
        # TODO(synk): pad H to a 128 multiple for the tiled fallback on ragged hidden dims.
        return None
    budget = cap // 3
    for t in range(H - 128, 0, -128):
        if H % t:
            continue
        if 2 * (D * t + t * Np) * itm <= budget:
            return t
    return 128


# ---------------------------------------------------------------------------
# pallas_call builders
# ---------------------------------------------------------------------------
def _call_resident(x_p, prep, tm_eff, vmem_limit, cost, single_buffer, out_dtype):
    B_pad, D = x_p.shape
    H = prep["w1"].shape[1]
    Np = prep["w2"].shape[1]
    kw = {"pipeline_mode": pl.Buffered(1)} if single_buffer else {}

    def const_spec(shape):
        # Grid-invariant operand: constant index_map; single-buffered when allowed.
        return pl.BlockSpec(shape, lambda i: (0, 0), **kw)

    return pl.pallas_call(
        _ff_kernel,
        out_shape=jax.ShapeDtypeStruct((B_pad, Np), out_dtype),
        grid_spec=pltpu.PrefetchScalarGridSpec(
            num_scalar_prefetch=0,
            grid=(B_pad // tm_eff,),
            in_specs=[
                pl.BlockSpec((tm_eff, D), lambda i: (i, 0)),   # x row tile (f32)
                const_spec((D, H)),                            # folded W1 (bf16)
                const_spec((1, H)),                            # folded bias (f32)
                const_spec((H, Np)),                           # W2 (bf16, lane-padded)
                const_spec((1, Np)),                           # b2 (f32, lane-padded)
            ],
            out_specs=pl.BlockSpec((tm_eff, Np), lambda i: (i, 0)),   # lane-dense slab
        ),
        compiler_params=pltpu.CompilerParams(
            dimension_semantics=("parallel",),
            vmem_limit_bytes=int(vmem_limit),
        ),
        cost_estimate=cost,
    )(x_p, prep["w1"], prep["b1"], prep["w2"], prep["b2"])


def _call_htiled(x_p, prep, tm_eff, th, vmem_limit, cost, out_dtype):
    B_pad, D = x_p.shape
    H = prep["w1"].shape[1]
    Np = prep["w2"].shape[1]
    return pl.pallas_call(
        _ff_kernel_htiled,
        out_shape=jax.ShapeDtypeStruct((B_pad, Np), out_dtype),
        grid_spec=pltpu.PrefetchScalarGridSpec(
            num_scalar_prefetch=0,
            grid=(B_pad // tm_eff, H // th),
            in_specs=[
                pl.BlockSpec((tm_eff, D), lambda i, k: (i, 0)),
                pl.BlockSpec((D, th), lambda i, k: (0, k)),
                pl.BlockSpec((1, th), lambda i, k: (0, k)),
                pl.BlockSpec((th, Np), lambda i, k: (k, 0)),
                pl.BlockSpec((1, Np), lambda i, k: (0, 0)),
            ],
            out_specs=pl.BlockSpec((tm_eff, Np), lambda i, k: (i, 0)),
            scratch_shapes=[pltpu.VMEM((tm_eff, Np), jnp.float32)],
        ),
        compiler_params=pltpu.CompilerParams(
            dimension_semantics=("parallel", "arbitrary"),
            vmem_limit_bytes=int(vmem_limit),
        ),
        cost_estimate=cost,
    )(x_p, prep["w1"], prep["b1"], prep["w2"], prep["b2"])


# ---------------------------------------------------------------------------
# Wrapper
# ---------------------------------------------------------------------------
def feed_forward(x, prep, *, tm=None, h_tile=None, out_dtype=jnp.float32):
    """x: (B, input_dim) float32.  prep: output of prepare_params.  -> (B, out_dim)."""
    B, D = x.shape
    H = prep["w1"].shape[1]
    Np = prep["w2"].shape[1]
    out_dim = prep["out_dim"]
    itm = jnp.dtype(prep["w1"].dtype).itemsize
    out_itm = jnp.dtype(out_dtype).itemsize

    cap = _vmem_cap()
    tm_max = tm if tm is not None else (512 if cap >= (80 << 20) else 256)
    tm_eff, B_pad = _pick_tm(B, tm_max)
    if B_pad != B:
        # Zero rows: only batch padding (x stays f32; cast happens in-kernel).
        x = jnp.pad(x, ((0, B_pad - B), (0, 0)))

    io_bytes = 2 * tm_eff * D * 4 + 2 * tm_eff * Np * out_itm   # double-buffered x / out
    slack = 4 << 20                                             # Mosaic internal scratch

    def inter_bytes(h_cols):
        # bf16 copy of x, f32 h, bf16 copy of h, f32 y before store.
        return tm_eff * D * itm + tm_eff * h_cols * (4 + itm) + tm_eff * Np * 4

    w_bytes = D * H * itm + H * 4 + H * Np * itm + Np * 4
    resident_need = w_bytes + io_bytes + inter_bytes(H) + slack
    flops = 2 * B_pad * (D * H + H * Np)

    th = h_tile
    if th is None and resident_need > cap:
        th = _pick_th(D, H, Np, itm, cap)

    if th is None:
        cost = pl.CostEstimate(
            flops=flops, transcendentals=0,
            bytes_accessed=B_pad * D * 4 + w_bytes + B_pad * Np * out_itm)
        vmem_limit = min(cap, max(resident_need, 16 << 20))
        try:
            out = _call_resident(x, prep, tm_eff, vmem_limit, cost,
                                 single_buffer=True, out_dtype=out_dtype)
        except Exception:
            # pl.Buffered(1) unsupported on this jax/libtpu: retry with default
            # double-buffered weights (needs ~2x weight VMEM).
            vmem_limit = min(cap, max(resident_need + w_bytes, 16 << 20))
            out = _call_resident(x, prep, tm_eff, vmem_limit, cost,
                                 single_buffer=False, out_dtype=out_dtype)
    else:
        assert H % th == 0 and th % 128 == 0, \
            "h_tile must be a multiple of 128 dividing the hidden dim"
        wchunk = D * th * itm + th * 4 + th * Np * itm
        need = 2 * wchunk + Np * 4 + io_bytes + tm_eff * Np * 4 + inter_bytes(th) + slack
        vmem_limit = min(cap, max(need, 16 << 20))
        cost = pl.CostEstimate(
            flops=flops, transcendentals=0,
            bytes_accessed=B_pad * D * 4 + (B_pad // tm_eff) * w_bytes
                           + B_pad * Np * out_itm)
        out = _call_htiled(x, prep, tm_eff, th, vmem_limit, cost, out_dtype)

    return out[:B, :out_dim]


# ---------------------------------------------------------------------------
# Init + references
# ---------------------------------------------------------------------------
def init_params(key, input_dim, hidden, output_dim):
    """PyTorch Linear-style init (U[-1/sqrt(fan_in), 1/sqrt(fan_in)]), weights pre-transposed."""
    k1, k2, k3, k4, k5, k6 = jax.random.split(key, 6)
    bnd1 = 1.0 / jnp.sqrt(input_dim)
    bnd2 = 1.0 / jnp.sqrt(hidden)
    return {
        "w1": jax.random.uniform(k1, (input_dim, hidden), jnp.float32, -bnd1, bnd1),
        "b1": jax.random.uniform(k2, (1, hidden), jnp.float32, -bnd1, bnd1),
        "w2": jax.random.uniform(k3, (hidden, output_dim), jnp.float32, -bnd2, bnd2),
        "b2": jax.random.uniform(k4, (1, output_dim), jnp.float32, -bnd2, bnd2),
        "gamma": 1.0 + 0.1 * jax.random.normal(k5, (1, hidden), jnp.float32),
        "beta": 0.1 * jax.random.normal(k6, (1, hidden), jnp.float32),
        "running_mean": jnp.zeros((1, hidden), jnp.float32),
        "running_var": jnp.ones((1, hidden), jnp.float32),
    }


def feed_forward_ref_f32(x, p):
    """Pure f32 reference (mirrors the PyTorch module in eval mode)."""
    h = x @ p["w1"] + p["b1"]
    h = (h - p["running_mean"]) * jax.lax.rsqrt(p["running_var"] + EPS) * p["gamma"] + p["beta"]
    h = jnp.maximum(h, 0.0)
    return h @ p["w2"] + p["b2"]


def feed_forward_ref_matched(x, prep):
    """Reference with the same folding / bf16 casts as the kernel."""
    xc = x.astype(prep["w1"].dtype)
    h = jnp.dot(xc, prep["w1"], preferred_element_type=jnp.float32) + prep["b1"]
    h = jnp.maximum(h, 0.0)
    y = jnp.dot(h.astype(prep["w2"].dtype), prep["w2"],
                preferred_element_type=jnp.float32) + prep["b2"]
    return y[:, :prep["out_dim"]]


if __name__ == "__main__":
    key = jax.random.PRNGKey(0)
    kx1, kx2, kp1, kp2 = jax.random.split(key, 4)

    # --- Case 1: config defaults (hidden_dim=128) -> resident-weight fast path ---
    batch, input_dim, hidden, output_dim = 16, 32, 128, 1
    x = jax.random.normal(kx1, (batch, input_dim), jnp.float32)
    params = init_params(kp1, input_dim, hidden, output_dim)
    prep = prepare_params(params)                    # one-time BN fold + bf16 cast

    out = jax.block_until_ready(feed_forward(x, prep))
    assert out.shape == (batch, output_dim)
    assert jnp.allclose(out, feed_forward_ref_matched(x, prep), atol=1e-3, rtol=1e-3), \
        "mismatch vs matched reference (case 1)"
    assert jnp.allclose(out, feed_forward_ref_f32(x, params), atol=5e-2, rtol=5e-2), \
        "mismatch vs f32 reference (case 1)"

    # --- Case 2: ragged batch + multi-column output; also exercise H-tiled fallback ---
    batch2, input_dim2, hidden2, output_dim2 = 37, 64, 256, 3
    x2 = jax.random.normal(kx2, (batch2, input_dim2), jnp.float32)
    params2 = init_params(kp2, input_dim2, hidden2, output_dim2)
    prep2 = prepare_params(params2)

    out2a = jax.block_until_ready(feed_forward(x2, prep2))               # resident path
    out2b = jax.block_until_ready(feed_forward(x2, prep2, h_tile=128))   # tiled fallback (2 H-steps)
    ref2 = feed_forward_ref_matched(x2, prep2)
    assert out2a.shape == (batch2, output_dim2)
    assert jnp.allclose(out2a, ref2, atol=1e-3, rtol=1e-3), "mismatch (case 2, resident)"
    assert jnp.allclose(out2b, ref2, atol=1e-3, rtol=1e-3), "mismatch (case 2, H-tiled)"
    assert jnp.allclose(out2a, feed_forward_ref_f32(x2, params2), atol=5e-2, rtol=5e-2), \
        "mismatch vs f32 reference (case 2)"

    # TODO(synk): training-mode Dropout and batch-stat BatchNorm (plus the module's
    # loss/optimizer/training-loop machinery) are out of scope for this forward kernel.
    print("KERNEL_OK")
</pallas_src>

<mosaic_0001>
module attributes {stable_mosaic.version = 11 : i64} {
  func.func @_ff_kernel(%arg0: i32, %arg1: memref<8x32xf32, #tpu.memory_space<vmem>>, %arg2: memref<32x128xbf16, #tpu.memory_space<vmem>>, %arg3: memref<1x128xf32, #tpu.memory_space<vmem>>, %arg4: memref<128x128xbf16, #tpu.memory_space<vmem>>, %arg5: memref<1x128xf32, #tpu.memory_space<vmem>>, %arg6: memref<8x128xf32, #tpu.memory_space<vmem>>) attributes {dimension_semantics = [#tpu.dimension_semantics<parallel>], iteration_bounds = array<i64: 2>, scalar_prefetch = 0 : i64, scratch_operands = 0 : i64, tpu.core_type = #tpu.core_type<tc>, window_params = [{transform_indices = @transform_0, window_bounds = array<i64: 8, 32>}, {pipeline_mode = #tpu.pipeline_mode<synchronous>, transform_indices = @transform_1, window_bounds = array<i64: 32, 128>}, {pipeline_mode = #tpu.pipeline_mode<synchronous>, transform_indices = @transform_2, window_bounds = array<i64: 1, 128>}, {pipeline_mode = #tpu.pipeline_mode<synchronous>, transform_indices = @transform_3, window_bounds = array<i64: 128, 128>}, {pipeline_mode = #tpu.pipeline_mode<synchronous>, transform_indices = @transform_4, window_bounds = array<i64: 1, 128>}, {transform_indices = @transform_5, window_bounds = array<i64: 8, 128>}]} {
    %c0 = arith.constant 0 : index
    %c0_0 = arith.constant 0 : index
    %0 = vector.load %arg1[%c0, %c0_0] : memref<8x32xf32, #tpu.memory_space<vmem>>, vector<8x32xf32>
    %1 = arith.truncf %0 : vector<8x32xf32> to vector<8x32xbf16>
    %c0_1 = arith.constant 0 : index
    %c0_2 = arith.constant 0 : index
    %2 = vector.load %arg2[%c0_1, %c0_2] : memref<32x128xbf16, #tpu.memory_space<vmem>>, vector<32x128xbf16>
    %cst = arith.constant dense<0.000000e+00> : vector<8x128xf32>
    %3 = tpu.matmul %1, %2, %cst {dimension_numbers = #tpu.dot_dimension_numbers<[1], [0], [0], [1], [0, 0, 1, 1], [], []>} : vector<8x32xbf16>, vector<32x128xbf16>, vector<8x128xf32> -> vector<8x128xf32>
    %c0_3 = arith.constant 0 : index
    %c0_4 = arith.constant 0 : index
    %4 = vector.load %arg3[%c0_3, %c0_4] : memref<1x128xf32, #tpu.memory_space<vmem>>, vector<1x128xf32>
    %5 = vector.broadcast %4 : vector<1x128xf32> to vector<8x128xf32>
    %6 = arith.addf %3, %5 : vector<8x128xf32>
    %cst_5 = arith.constant 0.000000e+00 : f32
    %7 = vector.broadcast %cst_5 : f32 to vector<8x128xf32>
    %8 = arith.maximumf %6, %7 : vector<8x128xf32>
    %9 = arith.truncf %8 : vector<8x128xf32> to vector<8x128xbf16>
    %c0_6 = arith.constant 0 : index
    %c0_7 = arith.constant 0 : index
    %10 = vector.load %arg4[%c0_6, %c0_7] : memref<128x128xbf16, #tpu.memory_space<vmem>>, vector<128x128xbf16>
    %cst_8 = arith.constant dense<0.000000e+00> : vector<8x128xf32>
    %11 = tpu.matmul %9, %10, %cst_8 {dimension_numbers = #tpu.dot_dimension_numbers<[1], [0], [0], [1], [0, 0, 1, 1], [], []>} : vector<8x128xbf16>, vector<128x128xbf16>, vector<8x128xf32> -> vector<8x128xf32>
    %c0_9 = arith.constant 0 : index
    %c0_10 = arith.constant 0 : index
    %12 = vector.load %arg5[%c0_9, %c0_10] : memref<1x128xf32, #tpu.memory_space<vmem>>, vector<1x128xf32>
    %13 = vector.broadcast %12 : vector<1x128xf32> to vector<8x128xf32>
    %14 = arith.addf %11, %13 : vector<8x128xf32>
    %c0_11 = arith.constant 0 : index
    %c0_12 = arith.constant 0 : index
    %15 = vector.load %arg6[%c0_11, %c0_12] : memref<8x128xf32, #tpu.memory_space<vmem>>, vector<8x128xf32>
    tpu.vector_store %arg6[%c0_11, %c0_12], %14 {strides = array<i32>} : memref<8x128xf32, #tpu.memory_space<vmem>>, vector<8x128xf32>,
    return
  }
  func.func @transform_0(%arg0: i32) -> (i32, i32) {
    %c0_i32 = arith.constant 0 : i32
    %c0_i32_0 = arith.constant 0 : i32
    return %arg0, %c0_i32 : i32, i32
  }
  func.func @transform_1(%arg0: i32) -> (i32, i32) {
    %c0_i32 = arith.constant 0 : i32
    %c0_i32_0 = arith.constant 0 : i32
    %c0_i32_1 = arith.constant 0 : i32
    return %c0_i32, %c0_i32_0 : i32, i32
  }
  func.func @transform_2(%arg0: i32) -> (i32, i32) {
    %c0_i32 = arith.constant 0 : i32
    %c0_i32_0 = arith.constant 0 : i32
    %c0_i32_1 = arith.constant 0 : i32
    return %c0_i32, %c0_i32_0 : i32, i32
  }
  func.func @transform_3(%arg0: i32) -> (i32, i32) {
    %c0_i32 = arith.constant 0 : i32
    %c0_i32_0 = arith.constant 0 : i32
    %c0_i32_1 = arith.constant 0 : i32
    return %c0_i32, %c0_i32_0 : i32, i32
  }
  func.func @transform_4(%arg0: i32) -> (i32, i32) {
    %c0_i32 = arith.constant 0 : i32
    %c0_i32_0 = arith.constant 0 : i32
    %c0_i32_1 = arith.constant 0 : i32
    return %c0_i32, %c0_i32_0 : i32, i32
  }
  func.func @transform_5(%arg0: i32) -> (i32, i32) {
    %c0_i32 = arith.constant 0 : i32
    %c0_i32_0 = arith.constant 0 : i32
    return %arg0, %c0_i32 : i32, i32
  }
}

module attributes {stable_mosaic.version = 11 : i64} {
  func.func @_ff_kernel(%arg0: i32, %arg1: memref<8x32xf32, #tpu.memory_space<vmem>>, %arg2: memref<32x128xbf16, #tpu.memory_space<vmem>>, %arg3: memref<1x128xf32, #tpu.memory_space<vmem>>, %arg4: memref<128x128xbf16, #tpu.memory_space<vmem>>, %arg5: memref<1x128xf32, #tpu.memory_space<vmem>>, %arg6: memref<8x128xf32, #tpu.memory_space<vmem>>) attributes {dimension_semantics = [#tpu.dimension_semantics<parallel>], iteration_bounds = array<i64: 2>, scalar_prefetch = 0 : i64, scratch_operands = 0 : i64, tpu.core_type = #tpu.core_type<tc>, window_params = [{transform_indices = @transform_0, window_bounds = array<i64: 8, 32>}, {pipeline_mode = #tpu.pipeline_mode<synchronous>, transform_indices = @transform_1, window_bounds = array<i64: 32, 128>}, {pipeline_mode = #tpu.pipeline_mode<synchronous>, transform_indices = @transform_2, window_bounds = array<i64: 1, 128>}, {pipeline_mode = #tpu.pipeline_mode<synchronous>, transform_indices = @transform_3, window_bounds = array<i64: 128, 128>}, {pipeline_mode = #tpu.pipeline_mode<synchronous>, transform_indices = @transform_4, window_bounds = array<i64: 1, 128>}, {transform_indices = @transform_5, window_bounds = array<i64: 8, 128>}]} {
    %c0 = arith.constant 0 : index
    %c0_0 = arith.constant 0 : index
    %0 = vector.load %arg1[%c0, %c0_0] : memref<8x32xf32, #tpu.memory_space<vmem>>, vector<8x32xf32>
    %1 = arith.truncf %0 : vector<8x32xf32> to vector<8x32xbf16>
    %c0_1 = arith.constant 0 : index
    %c0_2 = arith.constant 0 : index
    %2 = vector.load %arg2[%c0_1, %c0_2] : memref<32x128xbf16, #tpu.memory_space<vmem>>, vector<32x128xbf16>
    %cst = arith.constant dense<0.000000e+00> : vector<8x128xf32>
    %3 = tpu.matmul %1, %2, %cst {dimension_numbers = #tpu.dot_dimension_numbers<[1], [0], [0], [1], [0, 0, 1, 1], [], []>} : vector<8x32xbf16>, vector<32x128xbf16>, vector<8x128xf32> -> vector<8x128xf32>
    %c0_3 = arith.constant 0 : index
    %c0_4 = arith.constant 0 : index
    %4 = vector.load %arg3[%c0_3, %c0_4] : memref<1x128xf32, #tpu.memory_space<vmem>>, vector<1x128xf32>
    %5 = vector.broadcast %4 : vector<1x128xf32> to vector<8x128xf32>
    %6 = arith.addf %3, %5 : vector<8x128xf32>
    %cst_5 = arith.constant 0.000000e+00 : f32
    %7 = vector.broadcast %cst_5 : f32 to vector<8x128xf32>
    %8 = arith.maximumf %6, %7 : vector<8x128xf32>
    %9 = arith.truncf %8 : vector<8x128xf32> to vector<8x128xbf16>
    %c0_6 = arith.constant 0 : index
    %c0_7 = arith.constant 0 : index
    %10 = vector.load %arg4[%c0_6, %c0_7] : memref<128x128xbf16, #tpu.memory_space<vmem>>, vector<128x128xbf16>
    %cst_8 = arith.constant dense<0.000000e+00> : vector<8x128xf32>
    %11 = tpu.matmul %9, %10, %cst_8 {dimension_numbers = #tpu.dot_dimension_numbers<[1], [0], [0], [1], [0, 0, 1, 1], [], []>} : vector<8x128xbf16>, vector<128x128xbf16>, vector<8x128xf32> -> vector<8x128xf32>
    %c0_9 = arith.constant 0 : index
    %c0_10 = arith.constant 0 : index
    %12 = vector.load %arg5[%c0_9, %c0_10] : memref<1x128xf32, #tpu.memory_space<vmem>>, vector<1x128xf32>
    %13 = vector.broadcast %12 : vector<1x128xf32> to vector<8x128xf32>
    %14 = arith.addf %11, %13 : vector<8x128xf32>
    %c0_11 = arith.constant 0 : index
    %c0_12 = arith.constant 0 : index
    %15 = vector.load %arg6[%c0_11, %c0_12] : memref<8x128xf32, #tpu.memory_space<vmem>>, vector<8x128xf32>
    tpu.vector_store %arg6[%c0_11, %c0_12], %14 {strides = array<i32>} : memref<8x128xf32, #tpu.memory_space<vmem>>, vector<8x128xf32>,
    return
  }
  func.func @transform_0(%arg0: i32) -> (i32, i32) {
    %c0_i32 = arith.constant 0 : i32
    %c0_i32_0 = arith.constant 0 : i32
    return %arg0, %c0_i32 : i32, i32
  }
  func.func @transform_1(%arg0: i32) -> (i32, i32) {
    %c0_i32 = arith.constant 0 : i32
    %c0_i32_0 = arith.constant 0 : i32
    %c0_i32_1 = arith.constant 0 : i32
    return %c0_i32, %c0_i32_0 : i32, i32
  }
  func.func @transform_2(%arg0: i32) -> (i32, i32) {
    %c0_i32 = arith.constant 0 : i32
    %c0_i32_0 = arith.constant 0 : i32
    %c0_i32_1 = arith.constant 0 : i32
    return %c0_i32, %c0_i32_0 : i32, i32
  }
  func.func @transform_3(%arg0: i32) -> (i32, i32) {
    %c0_i32 = arith.constant 0 : i32
    %c0_i32_0 = arith.constant 0 : i32
    %c0_i32_1 = arith.constant 0 : i32
    return %c0_i32, %c0_i32_0 : i32, i32
  }
  func.func @transform_4(%arg0: i32) -> (i32, i32) {
    %c0_i32 = arith.constant 0 : i32
    %c0_i32_0 = arith.constant 0 : i32
    %c0_i32_1 = arith.constant 0 : i32
    return %c0_i32, %c0_i32_0 : i32, i32
  }
  func.func @transform_5(%arg0: i32) -> (i32, i32) {
    %c0_i32 = arith.constant 0 : i32
    %c0_i32_0 = arith.constant 0 : i32
    return %arg0, %c0_i32 : i32, i32
  }
}

</mosaic_0001>

<bundles_post_ra>
// kernel: tpu_custom_call.1
= control target key start
LH: loop header
LB: loop body
LE: loop exit
PB: predicated region body
PF: predicated region fallthrough
CT: control target
= control target key end

     0   :  { %10 = vsyncpa [#allocation3], 0  ;;  %s1081_s0 = inlined_call_operand.hbm [shape: f32[16,32], index: 0, kind: input, shape index: {}]   ;;  %s1082_s1 = inlined_call_operand.hbm [shape: bf16[32,128], index: 1, kind: input, shape index: {}]   ;;  %s1083_s2 = inlined_call_operand.vmem [shape: f32[1,128], index: 2, kind: input, shape index: {}]   ;;  %s1084_s3 = inlined_call_operand.hbm [shape: bf16[128,128], index: 3, kind: input, shape index: {}]   ;;  %s1085_s4 = inlined_call_operand.vmem [shape: f32[1,128], index: 4, kind: input, shape index: {}]   ;;  %s1086_s5 = inlined_call_operand.hbm [shape: f32[16,128], index: 5, kind: output, shape index: {}]  }
   0x1   :  { %12 = vsyncpa [#allocation3 + $0x1], 0 }
   0x2   :  { %13 = vsyncpa [#allocation6], 0 }
   0x3   :  { %14 = vsyncpa [#allocation4], 0 }
   0x4   :  { %16 = vsyncpa [#allocation4 + $0x1], 0  ;;  %s894_s18 = smov 0   ;;  %s896_s19 = smov 0  }
   0x5   :  { %s898_s20 = smov 0   ;;  %s900_s21 = smov 0  }
   0x6 LB: > { %s915_s22 = sadd.s32 4294967295, %s854_s21   ;;  %s556_s23 = sadd.s32 4294967294, %s854_s21   ;;  %s854_s21 = sphi %s900_s21, %s1108_s21   ;;  %s850_s20 = sphi %s898_s20, %s1107_s20   ;;  %s846_s19 = sphi %s896_s19, %s1106_s19   ;;  %s842_s18 = sphi %s894_s18, %s1105_s18  }
   0x7   : > { %p42_p0 = scmp.ne.s32.totalorder %s846_s19, %s842_s18  ;;  %p1087_p1 = scmp.eq.s32.totalorder %s915_s22, 0 }
   0x8   : > { %p156_p3 = scmp.eq.s32.totalorder %s556_s23, 1  ;;  %p557_p5 = scmp.ge.s32.totalorder %s854_s21, 1 }
   0x9   : > { %p924_p4 = por %p1087_p1, %p42_p0  ;;  %p163_p7 = scmp.lt.s32.totalorder %s854_s21, 3 }
   0xa   : > { %p929_p6 = por %p156_p3, %p42_p0  ;;  %s856_s27 = smov [#allocation5]  }
   0xb   : > { %s1091_s24 = scalar_select %p924_p4, 1, 0 }
   0xc   : > { %s1092_s25 = scalar_select %p929_p6, 1, 0 }
   0xd   : > { %p934_p8 = pnand %p557_p5, %p163_p7  ;;  %s175_s28 = sshll.u32 %s856_s27, 4  ;;  %s176_s28 = int_to_ptr.vmem [resolvable:$true] %s175_s28 }
   0xe   : > { %s857_s30 = smov [#allocation7]   ;;  %s717_s7 = scalar_lea.vmem %s176_s28, 256 }
   0xf   : > { %s1093_s26 = scalar_select %p934_p8, 1, 0 }
  0x10   : > { %p637_p9 = pneg %p934_p8  ;;  %s191_s6 = sshll.u32 %s857_s30, 4  ;;  %s192_s6 = int_to_ptr.vmem [resolvable:$true] %s191_s6 }
  0x11   : > { %p718_p13 = scmp.ne.s32.totalorder %s176_s28, %s717_s7  ;;  %p725_p5 = scmp.lt.s32.totalorder %s176_s28, %s176_s28 }
  0x12   : > { %p943_p11 = pnand %p637_p9, %p1087_p1  ;;  %p726_p7 = scmp.lt.s32.totalorder %s717_s7, %s717_s7 }
  0x14   : > { %p708_p12 = pneg %p943_p11  ;;  %p727_p10 = por %p726_p7, %p725_p5 }
  0x16   : > { %p720_p0 = pnand %p718_p13, %p708_p12 }
  0x18   : > { %p721_p3 = pneg %p720_p0 }
  0x1a   : > { %p728_p9 = pnand %p727_p10, %p721_p3 }
  0x1c   : > { %731 = shalt.err (!%p728_p9)
}
  0x1d   : > { %s858_s8 = smov 64   ;;  %s859_s9 = smov 4  }
  0x1e   : > { %640 = dma.hbm_to_vmem [thread:$0]  (!%p943_p11), %s1082_s1, 256, %s176_s28, [#allocation6], %s858_s8, %s858_s8, %s859_s9  }
  0x1f   : > { %s743_s12 = scalar_lea.vmem %s192_s6, 1024  ;;  %p751_p2 = scmp.lt.s32.totalorder %s192_s6, %s192_s6 }
  0x20   : > { %p744_p1 = scmp.ne.s32.totalorder %s192_s6, %s743_s12  ;;  %p752_p6 = scmp.lt.s32.totalorder %s743_s12, %s743_s12 }
  0x22   : > { %p746_p13 = pnand %p744_p1, %p708_p12  ;;  %p753_p5 = por %p752_p6, %p751_p2 }
  0x24   : > { %p747_p0 = pneg %p746_p13 }
  0x26   : > { %p754_p10 = pnand %p753_p5, %p747_p0 }
  0x28   : > { %757 = shalt.err (!%p754_p10)
}
  0x29   : > { %643 = dma.hbm_to_vmem [thread:$0]  (!%p943_p11), %s1084_s3, 1024, %s192_s6, [#allocation6], %s858_s8, %s858_s8, %s859_s9  }
  0x2a   : > { %s966_s15 = sadd.s32 1, %s854_s21   ;;  %s29_s16 = sadd.s32 1, %s850_s20 }
  0x2b   : > { %s26_s17 = ssub.s32 %s854_s21, %s966_s15  ;;  %p36_p1 = scmp.ne.s32.totalorder %s850_s20, %s846_s19 }
  0x2c   : > { %p27_p2 = scmp.eq.s32.totalorder %s26_s17, 0  ;;  %p37_p6 = scmp.eq.s32.totalorder %s854_s21, 0 }
  0x2d   : > { %p1095_p12 = scmp.eq.s32.totalorder %s915_s22, 1  ;;  %p654_p7 = scmp.lt.s32.totalorder %s854_s21, 2 }
  0x2e   : > { %s982_s27 = scalar_select %p27_p2, %s850_s20, %s29_s16  }
  0x2f   : > { %p976_p3 = por %p1095_p12, %p36_p1  ;;  %p38_p9 = por %p37_p6, %p36_p1 }
  0x30   : > { %s208_s28 = sand.u32 1, %s850_s20   ;;  %s562_s30 = sshll.u32 %s854_s21, 7 }
  0x31   : > { %s1096_s23 = scalar_select %p976_p3, 1, 0 }
  0x32   : > { %s561_s29 = sshll.u32 %s208_s28, 3  ;;  %s989_s8 = scalar_lea.hbm %s1081_s0, %s562_s30 }
  0x33   : > { %s212_s9 = scalar_lea.vmem [#allocation2], %s561_s29  ;;  %p991_p11 = pnand %p654_p7, %p38_p9 }
  0x34   : > { %s219_s10 = sshll.u32 %s212_s9, 4  ;;  %s209_s12 = scalar_lea.sflag [#allocation3], %s208_s28  ;;  %s220_s10 = int_to_ptr.vmem [resolvable:$true] %s219_s10 }
  0x35   : > { %s758_s13 = scalar_lea.hbm %s989_s8, 128  ;;  %p760_p0 = pneg %p991_p11 }
  0x36   : > { %p759_p13 = scmp.ne.s32.totalorder %s989_s8, %s758_s13  ;;  %s763_s17 = scalar_lea.hbm %s1081_s0, 256 }
  0x37   : > { %p764_p1 = scmp.lt.s32.totalorder %s989_s8, %s1081_s0  ;;  %p765_p2 = scmp.lt.s32.totalorder %s763_s17, %s758_s13 }
  0x38   : > { %p761_p5 = pnand %p760_p0, %p759_p13 }
  0x39   : > { %p766_p6 = por %p765_p2, %p764_p1 }
  0x3a   : > { %p762_p10 = pneg %p761_p5 }
  0x3c   : > { %p767_p12 = pnand %p766_p6, %p762_p10 }
  0x3e   : > { %770 = shalt.err (!%p767_p12)
}
  0x3f   : > { %s771_s6 = scalar_lea.vmem %s220_s10, 128  ;;  %s860_s28 = smov [#allocation2]  }
  0x40   : > { %p772_p7 = scmp.ne.s32.totalorder %s220_s10, %s771_s6  ;;  %s776_s7 = sshll.u32 %s860_s28, 4  ;;  %s777_s7 = int_to_ptr.vmem [resolvable:$false] %s776_s7 }
  0x41   : > { %s778_s9 = scalar_lea.vmem %s777_s7, 256  ;;  %p779_p13 = scmp.lt.s32.totalorder %s220_s10, %s777_s7 }
  0x42   : > { %p774_p9 = pnand %p772_p7, %p760_p0  ;;  %p780_p5 = scmp.lt.s32.totalorder %s778_s9, %s771_s6 }
  0x44   : > { %p775_p3 = pneg %p774_p9  ;;  %p781_p4 = por %p780_p5, %p779_p13 }
  0x46   : > { %p782_p8 = pnand %p781_p4, %p775_p3 }
  0x48   : > { %785 = shalt.err (!%p782_p8)
}
  0x49   : > { %647 = dma.hbm_to_vmem [thread:$0]  (!%p991_p11), %s989_s8, 128, %s220_s10, %s209_s12  }
  0x4a   : > { %p1098_p10 = scmp.ne.s32.totalorder %s1093_s26, 0 }
  0x4b   : > { %s1012_s13 = sand.u32 (!%p1098_p10), 1, %s846_s19   ;;  %p1099_p4 = scmp.ne.s32.totalorder (!%p1098_p10), %s1091_s24, 0 }
  0x4c   : > { %228 = sbr.rel (%p1098_p10) target bundleno = 503 (0x1f7), region = 40  ;;  %s564_s14 = sshll.u32 (!%p1098_p10), %s1012_s13, 3 }
  0x4d   : > { %s231_s16 = scalar_lea.sflag (!%p1098_p10), [#allocation3], %s1012_s13  ;;  %s234_s17 = scalar_lea.vmem (!%p1098_p10), [#allocation2], %s564_s14 }
  0x51   : > { %829 = dma.done.wait (%p1099_p4), %s231_s16, 128  }
  0x52   : > { %831 = vsyncadd (%p1099_p4), %s231_s16, 4294967168  ;;  %p1100_p8 = scmp.eq.s32.totalorder %s915_s22, 0 }
  0x54   : > { %833 = dma.done.wait (%p1100_p8), [#allocation6], 1280   ;;  %p1101_p3 = pmov %p1100_p8 }
  0x55   : > { %v861_v0 = vmov 0.0   ;;  %vm862_vm0 = vmmov 0   ;;  %v696_v1 = vld [vmem:[#allocation5 + $0x8] sm:$0xff]   ;;  %v697_v2 = vld [vmem:[#allocation5] sm:$0xff]   ;;  %v270_v3 = vld [vmem:[%s234_s17] sm:$0xff]  ;;  %vm295_vm1 = vcmask 261120  }
  0x56   : > { %835 = vsyncadd (%p1101_p3), [#allocation6], 4294966016  ;;  %597 = vmatprep.subr.bf16.mxu0 %v861_v0  ;;  %601 = vmatprep.mubr.msk.bf16.mxu0 %vm862_vm0, %v861_v0  ;;  %v698_v4 = vld [vmem:[#allocation7 + $0x38] sm:$0xff]   ;;  %v271_v5 = vpack.c.bf16 %v270_v3, %v270_v3  ;;  %v699_v6 = vld [vmem:[#allocation7 + $0x30] sm:$0xff]   ;;  %s582_s11 = sshll.u32 %s915_s22, 7  ;;  %s268_s12 = scalar_lea.vmem [#allocation8], %s564_s14 }
  0x57   : > { %605 = vmatprep.subr.bf16.mxu1 %v861_v0  ;;  %621 = vmatprep.mubr.msk.bf16.mxu1 %vm862_vm0, %v861_v0  ;;  %v700_v7 = vld [vmem:[#allocation7 + $0x28] sm:$0xff]   ;;  %v701_v8 = vld [vmem:[#allocation7 + $0x20] sm:$0xff]   ;;  %v702_v9 = vld [vmem:[#allocation7 + $0x18] sm:$0xff]   ;;  %s467_s30 = sshll.u32 %s268_s12, 4  ;;  %s1038_s28 = scalar_lea.hbm %s1086_s5, %s582_s11  ;;  %s1040_s30 = int_to_ptr.vmem [resolvable:$true] %s467_s30 }
  0x58   : > { %598 = vmatpush3.bf16.msra.mxu0 %v696_v1  ;;  %606 = vmatpush3.bf16.msra.mxu1 %v698_v4  ;;  %v703_v10 = vld [vmem:[#allocation7 + $0x10] sm:$0xff]   ;;  %v704_v11 = vld [vmem:[#allocation7 + $0x8] sm:$0xff]   ;;  %v705_v12 = vld [vmem:[#allocation7] sm:$0xff]   ;;  %s454_s7 = scalar_lea.sflag [#allocation4], %s1012_s13  ;;  %s786_s22 = scalar_lea.vmem %s1040_s30, 128 }
  0x59   : > { %599 = vmatprep.subr.bf16.mxu0 %v861_v0  ;;  %607 = vmatprep.subr.bf16.mxu1 %v861_v0  ;;  %v568_v13 = vld [vmem:[%s1083_s2] ss:$0 sm:$0xff]  ;;  %p787_p11 = scmp.ne.s32.totalorder %s1040_s30, %s786_s22  ;;  %p1102_p0 = scmp.ne.s32.totalorder %s1096_s23, 0 }
  0x5a   : > { %v572_v21 = vld [vmem:[%s1085_s4] ss:$0 sm:$0xff]  ;;  %s863_s9 = smov [#allocation8]  }
  0x5b   : > { %p788_p1 = pnand %p787_p11, %p1102_p0  ;;  %s790_s14 = sshll.u32 %s863_s9, 4  ;;  %s791_s14 = int_to_ptr.vmem [resolvable:$false] %s790_s14 }
  0x5c   : > { %600 = vmatpush3.bf16.msra.mxu0 %v697_v2  ;;  %608 = vmatpush3.bf16.msra.mxu1 %v699_v6  ;;  %s792_s16 = scalar_lea.vmem %s791_s14, 256  ;;  %p793_p6 = scmp.lt.s32.totalorder %s1040_s30, %s791_s14 }
  0x5d   : > { %609 = vmatprep.subr.bf16.mxu1 %v861_v0  ;;  %p789_p2 = pneg %p788_p1  ;;  %p794_p12 = scmp.lt.s32.totalorder %s792_s16, %s786_s22 }
  0x5f   : > { %602 = vmatmul.mubr.msk.bf16.vlgmr.msra.gmra.mxu0 %vm295_vm1, %v271_v5  ;;  %p795_p7 = por %p794_p12, %p793_p6 }
  0x60   : > { %610 = vmatpush3.bf16.msra.mxu1 %v700_v7 }
  0x61   : > { %611 = vmatprep.subr.bf16.mxu1 %v861_v0  ;;  %p796_p9 = pnand %p795_p7, %p789_p2 }
  0x64   : > { %612 = vmatpush3.bf16.msra.mxu1 %v701_v8 }
  0x65   : > { %613 = vmatprep.subr.bf16.mxu1 %v861_v0 }
  0x68   : > { %614 = vmatpush3.bf16.msra.mxu1 %v702_v9 }
  0x69   : > { %615 = vmatprep.subr.bf16.mxu1 %v861_v0 }
  0x6c   : > { %616 = vmatpush3.bf16.msra.mxu1 %v703_v10 }
  0x6d   : > { %617 = vmatprep.subr.bf16.mxu1 %v861_v0 }
  0x70   : > { %618 = vmatpush3.bf16.msra.mxu1 %v704_v11 }
  0x71   : > { %619 = vmatprep.subr.bf16.mxu1 %v861_v0 }
  0x74   : > { %620 = vmatpush3.bf16.msra.mxu1 %v705_v12 }
 0x11f   : > { %v333_v14 = vpop.f32.mrf.mxu0 }
 0x120   : > { %v334_v15 = vadd.f32 %v568_v13, %v333_v14 }
 0x121   : > { %v603_v16 = vpop.f32.mrf.mxu0 }
 0x122   : > { %v339_v17 = vmax.f32 %v334_v15, 0.0 }
 0x123   : > { %v336_v18 = vpop.f32.mrf.mxu0 }
 0x124   : > { %v340_v19 = vpack.c.bf16 %v339_v17, %v339_v17 }
 0x125   : > { %v604_v20 = vpop.f32.mrf.mxu0 }
 0x126   : > { %622 = vmatmul.mubr.bf16.vlgmr.msra.gmra.mxu1 %v340_v19 }
 0x1e6   : > { %v446_v22 = vpop.f32.mrf.mxu1 }
 0x1e7   : > { %v447_v23 = vadd.f32 %v572_v21, %v446_v22 }
 0x1e8   : > { %v623_v24 = vpop.f32.mrf.mxu1 }
 0x1e9   : > { %452 = vst [vmem:[%s268_s12] sm:$0xff] %v447_v23 }
 0x1ea   : > { %v449_v25 = vpop.f32.mrf.mxu1 }
 0x1eb   : > { %799 = shalt.err (!%p796_p9)
}
 0x1ec   : > { %s800_s17 = scalar_lea.hbm %s1038_s28, 128  ;;  %s804_s26 = scalar_lea.hbm %s1086_s5, 256 }
 0x1ed   : > { %p801_p13 = scmp.ne.s32.totalorder %s1038_s28, %s800_s17  ;;  %p805_p4 = scmp.lt.s32.totalorder %s1038_s28, %s1086_s5 }
 0x1ee   : > { %p806_p8 = scmp.lt.s32.totalorder %s804_s26, %s800_s17 }
 0x1ef   : > { %p802_p5 = pnand %p801_p13, %p1102_p0 }
 0x1f0   : > { %p807_p3 = por %p806_p8, %p805_p4 }
 0x1f1   : > { %p803_p10 = pneg %p802_p5 }
 0x1f3   : > { %p808_p11 = pnand %p807_p3, %p803_p10 }
 0x1f5   : > { %811 = shalt.err (!%p808_p11)
}
 0x1f6   : > { %635 = dma.vmem_to_hbm [thread:$0]  (%p1102_p0), %s1040_s30, 128, %s1038_s28, %s454_s7   ;;  %v624_v26 = vpop.f32.mrf.mxu1 }
 0x1f7 PF: > { %s479_s11 = sand.u32 1, %s842_s18   ;;  %p1103_p1 = scmp.ne.s32.totalorder %s1092_s25, 0 }
 0x1f8   : > { %p1104_p2 = scmp.ge.s32.totalorder %s854_s21, 2  ;;  %s480_s12 = scalar_lea.sflag [#allocation4], %s479_s11 }
 0x1fa   : > { %p649_p6 = pnand %p1104_p2, %p1103_p1 }
 0x1fc   : > { %p650_p12 = pneg %p649_p6 }
 0x1fe   : > { %837 = dma.done.wait (%p650_p12), %s480_s12, 128  }
 0x1ff   : > { %839 = vsyncadd (%p650_p12), %s480_s12, 4294967168  ;;  %p19_p7 = scmp.ge.s32.totalorder %s966_s15, 4   ;;  %s1105_s18 = smov %s846_s19 }
 0x200   : > { %s1106_s19 = smov %s850_s20  ;;  %s1107_s20 = smov %s982_s27 }
 0x201   : > { %s1108_s21 = smov %s966_s15  ;;  %21 = sbr.rel (!%p19_p7) target bundleno = 6 (0x6), region = 93 }
 0x206   :  { %485 = vsyncpa [#allocation3], 1 }
 0x207   :  { %487 = vsyncpa [#allocation3 + $0x1], 1 }
 0x208   :  { %488 = vsyncpa [#allocation6], 1 }
 0x209   :  { %489 = vsyncpa [#allocation4], 1 }
 0x20a   :  { %491 = vsyncpa [#allocation4 + $0x1], 1 }

// kernel: tpu_custom_call.1
= control target key start
LH: loop header
LB: loop body
LE: loop exit
PB: predicated region body
PF: predicated region fallthrough
CT: control target
= control target key end

     0   :  { %10 = vsyncpa [#allocation3], 0  ;;  %s1081_s0 = inlined_call_operand.hbm [shape: f32[16,32], index: 0, kind: input, shape index: {}]   ;;  %s1082_s1 = inlined_call_operand.hbm [shape: bf16[32,128], index: 1, kind: input, shape index: {}]   ;;  %s1083_s2 = inlined_call_operand.vmem [shape: f32[1,128], index: 2, kind: input, shape index: {}]   ;;  %s1084_s3 = inlined_call_operand.hbm [shape: bf16[128,128], index: 3, kind: input, shape index: {}]   ;;  %s1085_s4 = inlined_call_operand.vmem [shape: f32[1,128], index: 4, kind: input, shape index: {}]   ;;  %s1086_s5 = inlined_call_operand.hbm [shape: f32[16,128], index: 5, kind: output, shape index: {}]  }
   0x1   :  { %12 = vsyncpa [#allocation3 + $0x1], 0 }
   0x2   :  { %13 = vsyncpa [#allocation6], 0 }
   0x3   :  { %14 = vsyncpa [#allocation4], 0 }
   0x4   :  { %16 = vsyncpa [#allocation4 + $0x1], 0  ;;  %s894_s18 = smov 0   ;;  %s896_s19 = smov 0  }
   0x5   :  { %s898_s20 = smov 0   ;;  %s900_s21 = smov 0  }
   0x6 LB: > { %s915_s22 = sadd.s32 4294967295, %s854_s21   ;;  %s556_s23 = sadd.s32 4294967294, %s854_s21   ;;  %s854_s21 = sphi %s900_s21, %s1108_s21   ;;  %s850_s20 = sphi %s898_s20, %s1107_s20   ;;  %s846_s19 = sphi %s896_s19, %s1106_s19   ;;  %s842_s18 = sphi %s894_s18, %s1105_s18  }
   0x7   : > { %p42_p0 = scmp.ne.s32.totalorder %s846_s19, %s842_s18  ;;  %p1087_p1 = scmp.eq.s32.totalorder %s915_s22, 0 }
   0x8   : > { %p156_p3 = scmp.eq.s32.totalorder %s556_s23, 1  ;;  %p557_p5 = scmp.ge.s32.totalorder %s854_s21, 1 }
   0x9   : > { %p924_p4 = por %p1087_p1, %p42_p0  ;;  %p163_p7 = scmp.lt.s32.totalorder %s854_s21, 3 }
   0xa   : > { %p929_p6 = por %p156_p3, %p42_p0  ;;  %s856_s27 = smov [#allocation5]  }
   0xb   : > { %s1091_s24 = scalar_select %p924_p4, 1, 0 }
   0xc   : > { %s1092_s25 = scalar_select %p929_p6, 1, 0 }
   0xd   : > { %p934_p8 = pnand %p557_p5, %p163_p7  ;;  %s175_s28 = sshll.u32 %s856_s27, 4  ;;  %s176_s28 = int_to_ptr.vmem [resolvable:$true] %s175_s28 }
   0xe   : > { %s857_s30 = smov [#allocation7]   ;;  %s717_s7 = scalar_lea.vmem %s176_s28, 256 }
   0xf   : > { %s1093_s26 = scalar_select %p934_p8, 1, 0 }
  0x10   : > { %p637_p9 = pneg %p934_p8  ;;  %s191_s6 = sshll.u32 %s857_s30, 4  ;;  %s192_s6 = int_to_ptr.vmem [resolvable:$true] %s191_s6 }
  0x11   : > { %p718_p13 = scmp.ne.s32.totalorder %s176_s28, %s717_s7  ;;  %p725_p5 = scmp.lt.s32.totalorder %s176_s28, %s176_s28 }
  0x12   : > { %p943_p11 = pnand %p637_p9, %p1087_p1  ;;  %p726_p7 = scmp.lt.s32.totalorder %s717_s7, %s717_s7 }
  0x14   : > { %p708_p12 = pneg %p943_p11  ;;  %p727_p10 = por %p726_p7, %p725_p5 }
  0x16   : > { %p720_p0 = pnand %p718_p13, %p708_p12 }
  0x18   : > { %p721_p3 = pneg %p720_p0 }
  0x1a   : > { %p728_p9 = pnand %p727_p10, %p721_p3 }
  0x1c   : > { %731 = shalt.err (!%p728_p9)
}
  0x1d   : > { %s858_s8 = smov 64   ;;  %s859_s9 = smov 4  }
  0x1e   : > { %640 = dma.hbm_to_vmem [thread:$0]  (!%p943_p11), %s1082_s1, 256, %s176_s28, [#allocation6], %s858_s8, %s858_s8, %s859_s9  }
  0x1f   : > { %s743_s12 = scalar_lea.vmem %s192_s6, 1024  ;;  %p751_p2 = scmp.lt.s32.totalorder %s192_s6, %s192_s6 }
  0x20   : > { %p744_p1 = scmp.ne.s32.totalorder %s192_s6, %s743_s12  ;;  %p752_p6 = scmp.lt.s32.totalorder %s743_s12, %s743_s12 }
  0x22   : > { %p746_p13 = pnand %p744_p1, %p708_p12  ;;  %p753_p5 = por %p752_p6, %p751_p2 }
  0x24   : > { %p747_p0 = pneg %p746_p13 }
  0x26   : > { %p754_p10 = pnand %p753_p5, %p747_p0 }
  0x28   : > { %757 = shalt.err (!%p754_p10)
}
  0x29   : > { %643 = dma.hbm_to_vmem [thread:$0]  (!%p943_p11), %s1084_s3, 1024, %s192_s6, [#allocation6], %s858_s8, %s858_s8, %s859_s9  }
  0x2a   : > { %s966_s15 = sadd.s32 1, %s854_s21   ;;  %s29_s16 = sadd.s32 1, %s850_s20 }
  0x2b   : > { %s26_s17 = ssub.s32 %s854_s21, %s966_s15  ;;  %p36_p1 = scmp.ne.s32.totalorder %s850_s20, %s846_s19 }
  0x2c   : > { %p27_p2 = scmp.eq.s32.totalorder %s26_s17, 0  ;;  %p37_p6 = scmp.eq.s32.totalorder %s854_s21, 0 }
  0x2d   : > { %p1095_p12 = scmp.eq.s32.totalorder %s915_s22, 1  ;;  %p654_p7 = scmp.lt.s32.totalorder %s854_s21, 2 }
  0x2e   : > { %s982_s27 = scalar_select %p27_p2, %s850_s20, %s29_s16  }
  0x2f   : > { %p976_p3 = por %p1095_p12, %p36_p1  ;;  %p38_p9 = por %p37_p6, %p36_p1 }
  0x30   : > { %s208_s28 = sand.u32 1, %s850_s20   ;;  %s562_s30 = sshll.u32 %s854_s21, 7 }
  0x31   : > { %s1096_s23 = scalar_select %p976_p3, 1, 0 }
  0x32   : > { %s561_s29 = sshll.u32 %s208_s28, 3  ;;  %s989_s8 = scalar_lea.hbm %s1081_s0, %s562_s30 }
  0x33   : > { %s212_s9 = scalar_lea.vmem [#allocation2], %s561_s29  ;;  %p991_p11 = pnand %p654_p7, %p38_p9 }
  0x34   : > { %s219_s10 = sshll.u32 %s212_s9, 4  ;;  %s209_s12 = scalar_lea.sflag [#allocation3], %s208_s28  ;;  %s220_s10 = int_to_ptr.vmem [resolvable:$true] %s219_s10 }
  0x35   : > { %s758_s13 = scalar_lea.hbm %s989_s8, 128  ;;  %p760_p0 = pneg %p991_p11 }
  0x36   : > { %p759_p13 = scmp.ne.s32.totalorder %s989_s8, %s758_s13  ;;  %s763_s17 = scalar_lea.hbm %s1081_s0, 256 }
  0x37   : > { %p764_p1 = scmp.lt.s32.totalorder %s989_s8, %s1081_s0  ;;  %p765_p2 = scmp.lt.s32.totalorder %s763_s17, %s758_s13 }
  0x38   : > { %p761_p5 = pnand %p760_p0, %p759_p13 }
  0x39   : > { %p766_p6 = por %p765_p2, %p764_p1 }
  0x3a   : > { %p762_p10 = pneg %p761_p5 }
  0x3c   : > { %p767_p12 = pnand %p766_p6, %p762_p10 }
  0x3e   : > { %770 = shalt.err (!%p767_p12)
}
  0x3f   : > { %s771_s6 = scalar_lea.vmem %s220_s10, 128  ;;  %s860_s28 = smov [#allocation2]  }
  0x40   : > { %p772_p7 = scmp.ne.s32.totalorder %s220_s10, %s771_s6  ;;  %s776_s7 = sshll.u32 %s860_s28, 4  ;;  %s777_s7 = int_to_ptr.vmem [resolvable:$false] %s776_s7 }
  0x41   : > { %s778_s9 = scalar_lea.vmem %s777_s7, 256  ;;  %p779_p13 = scmp.lt.s32.totalorder %s220_s10, %s777_s7 }
  0x42   : > { %p774_p9 = pnand %p772_p7, %p760_p0  ;;  %p780_p5 = scmp.lt.s32.totalorder %s778_s9, %s771_s6 }
  0x44   : > { %p775_p3 = pneg %p774_p9  ;;  %p781_p4 = por %p780_p5, %p779_p13 }
  0x46   : > { %p782_p8 = pnand %p781_p4, %p775_p3 }
  0x48   : > { %785 = shalt.err (!%p782_p8)
}
  0x49   : > { %647 = dma.hbm_to_vmem [thread:$0]  (!%p991_p11), %s989_s8, 128, %s220_s10, %s209_s12  }
  0x4a   : > { %p1098_p10 = scmp.ne.s32.totalorder %s1093_s26, 0 }
  0x4b   : > { %s1012_s13 = sand.u32 (!%p1098_p10), 1, %s846_s19   ;;  %p1099_p4 = scmp.ne.s32.totalorder (!%p1098_p10), %s1091_s24, 0 }
  0x4c   : > { %228 = sbr.rel (%p1098_p10) target bundleno = 503 (0x1f7), region = 40  ;;  %s564_s14 = sshll.u32 (!%p1098_p10), %s1012_s13, 3 }
  0x4d   : > { %s231_s16 = scalar_lea.sflag (!%p1098_p10), [#allocation3], %s1012_s13  ;;  %s234_s17 = scalar_lea.vmem (!%p1098_p10), [#allocation2], %s564_s14 }
  0x51   : > { %829 = dma.done.wait (%p1099_p4), %s231_s16, 128  }
  0x52   : > { %831 = vsyncadd (%p1099_p4), %s231_s16, 4294967168  ;;  %p1100_p8 = scmp.eq.s32.totalorder %s915_s22, 0 }
  0x54   : > { %833 = dma.done.wait (%p1100_p8), [#allocation6], 1280   ;;  %p1101_p3 = pmov %p1100_p8 }
  0x55   : > { %v861_v0 = vmov 0.0   ;;  %vm862_vm0 = vmmov 0   ;;  %v696_v1 = vld [vmem:[#allocation5 + $0x8] sm:$0xff]   ;;  %v697_v2 = vld [vmem:[#allocation5] sm:$0xff]   ;;  %v270_v3 = vld [vmem:[%s234_s17] sm:$0xff]  ;;  %vm295_vm1 = vcmask 261120  }
  0x56   : > { %835 = vsyncadd (%p1101_p3), [#allocation6], 4294966016  ;;  %597 = vmatprep.subr.bf16.mxu0 %v861_v0  ;;  %601 = vmatprep.mubr.msk.bf16.mxu0 %vm862_vm0, %v861_v0  ;;  %v698_v4 = vld [vmem:[#allocation7 + $0x38] sm:$0xff]   ;;  %v271_v5 = vpack.c.bf16 %v270_v3, %v270_v3  ;;  %v699_v6 = vld [vmem:[#allocation7 + $0x30] sm:$0xff]   ;;  %s582_s11 = sshll.u32 %s915_s22, 7  ;;  %s268_s12 = scalar_lea.vmem [#allocation8], %s564_s14 }
  0x57   : > { %605 = vmatprep.subr.bf16.mxu1 %v861_v0  ;;  %621 = vmatprep.mubr.msk.bf16.mxu1 %vm862_vm0, %v861_v0  ;;  %v700_v7 = vld [vmem:[#allocation7 + $0x28] sm:$0xff]   ;;  %v701_v8 = vld [vmem:[#allocation7 + $0x20] sm:$0xff]   ;;  %v702_v9 = vld [vmem:[#allocation7 + $0x18] sm:$0xff]   ;;  %s467_s30 = sshll.u32 %s268_s12, 4  ;;  %s1038_s28 = scalar_lea.hbm %s1086_s5, %s582_s11  ;;  %s1040_s30 = int_to_ptr.vmem [resolvable:$true] %s467_s30 }
  0x58   : > { %598 = vmatpush3.bf16.msra.mxu0 %v696_v1  ;;  %606 = vmatpush3.bf16.msra.mxu1 %v698_v4  ;;  %v703_v10 = vld [vmem:[#allocation7 + $0x10] sm:$0xff]   ;;  %v704_v11 = vld [vmem:[#allocation7 + $0x8] sm:$0xff]   ;;  %v705_v12 = vld [vmem:[#allocation7] sm:$0xff]   ;;  %s454_s7 = scalar_lea.sflag [#allocation4], %s1012_s13  ;;  %s786_s22 = scalar_lea.vmem %s1040_s30, 128 }
  0x59   : > { %599 = vmatprep.subr.bf16.mxu0 %v861_v0  ;;  %607 = vmatprep.subr.bf16.mxu1 %v861_v0  ;;  %v568_v13 = vld [vmem:[%s1083_s2] ss:$0 sm:$0xff]  ;;  %p787_p11 = scmp.ne.s32.totalorder %s1040_s30, %s786_s22  ;;  %p1102_p0 = scmp.ne.s32.totalorder %s1096_s23, 0 }
  0x5a   : > { %v572_v21 = vld [vmem:[%s1085_s4] ss:$0 sm:$0xff]  ;;  %s863_s9 = smov [#allocation8]  }
  0x5b   : > { %p788_p1 = pnand %p787_p11, %p1102_p0  ;;  %s790_s14 = sshll.u32 %s863_s9, 4  ;;  %s791_s14 = int_to_ptr.vmem [resolvable:$false] %s790_s14 }
  0x5c   : > { %600 = vmatpush3.bf16.msra.mxu0 %v697_v2  ;;  %608 = vmatpush3.bf16.msra.mxu1 %v699_v6  ;;  %s792_s16 = scalar_lea.vmem %s791_s14, 256  ;;  %p793_p6 = scmp.lt.s32.totalorder %s1040_s30, %s791_s14 }
  0x5d   : > { %609 = vmatprep.subr.bf16.mxu1 %v861_v0  ;;  %p789_p2 = pneg %p788_p1  ;;  %p794_p12 = scmp.lt.s32.totalorder %s792_s16, %s786_s22 }
  0x5f   : > { %602 = vmatmul.mubr.msk.bf16.vlgmr.msra.gmra.mxu0 %vm295_vm1, %v271_v5  ;;  %p795_p7 = por %p794_p12, %p793_p6 }
  0x60   : > { %610 = vmatpush3.bf16.msra.mxu1 %v700_v7 }
  0x61   : > { %611 = vmatprep.subr.bf16.mxu1 %v861_v0  ;;  %p796_p9 = pnand %p795_p7, %p789_p2 }
  0x64   : > { %612 = vmatpush3.bf16.msra.mxu1 %v701_v8 }
  0x65   : > { %613 = vmatprep.subr.bf16.mxu1 %v861_v0 }
  0x68   : > { %614 = vmatpush3.bf16.msra.mxu1 %v702_v9 }
  0x69   : > { %615 = vmatprep.subr.bf16.mxu1 %v861_v0 }
  0x6c   : > { %616 = vmatpush3.bf16.msra.mxu1 %v703_v10 }
  0x6d   : > { %617 = vmatprep.subr.bf16.mxu1 %v861_v0 }
  0x70   : > { %618 = vmatpush3.bf16.msra.mxu1 %v704_v11 }
  0x71   : > { %619 = vmatprep.subr.bf16.mxu1 %v861_v0 }
  0x74   : > { %620 = vmatpush3.bf16.msra.mxu1 %v705_v12 }
 0x11f   : > { %v333_v14 = vpop.f32.mrf.mxu0 }
 0x120   : > { %v334_v15 = vadd.f32 %v568_v13, %v333_v14 }
 0x121   : > { %v603_v16 = vpop.f32.mrf.mxu0 }
 0x122   : > { %v339_v17 = vmax.f32 %v334_v15, 0.0 }
 0x123   : > { %v336_v18 = vpop.f32.mrf.mxu0 }
 0x124   : > { %v340_v19 = vpack.c.bf16 %v339_v17, %v339_v17 }
 0x125   : > { %v604_v20 = vpop.f32.mrf.mxu0 }
 0x126   : > { %622 = vmatmul.mubr.bf16.vlgmr.msra.gmra.mxu1 %v340_v19 }
 0x1e6   : > { %v446_v22 = vpop.f32.mrf.mxu1 }
 0x1e7   : > { %v447_v23 = vadd.f32 %v572_v21, %v446_v22 }
 0x1e8   : > { %v623_v24 = vpop.f32.mrf.mxu1 }
 0x1e9   : > { %452 = vst [vmem:[%s268_s12] sm:$0xff] %v447_v23 }
 0x1ea   : > { %v449_v25 = vpop.f32.mrf.mxu1 }
 0x1eb   : > { %799 = shalt.err (!%p796_p9)
}
 0x1ec   : > { %s800_s17 = scalar_lea.hbm %s1038_s28, 128  ;;  %s804_s26 = scalar_lea.hbm %s1086_s5, 256 }
 0x1ed   : > { %p801_p13 = scmp.ne.s32.totalorder %s1038_s28, %s800_s17  ;;  %p805_p4 = scmp.lt.s32.totalorder %s1038_s28, %s1086_s5 }
 0x1ee   : > { %p806_p8 = scmp.lt.s32.totalorder %s804_s26, %s800_s17 }
 0x1ef   : > { %p802_p5 = pnand %p801_p13, %p1102_p0 }
 0x1f0   : > { %p807_p3 = por %p806_p8, %p805_p4 }
 0x1f1   : > { %p803_p10 = pneg %p802_p5 }
 0x1f3   : > { %p808_p11 = pnand %p807_p3, %p803_p10 }
 0x1f5   : > { %811 = shalt.err (!%p808_p11)
}
 0x1f6   : > { %635 = dma.vmem_to_hbm [thread:$0]  (%p1102_p0), %s1040_s30, 128, %s1038_s28, %s454_s7   ;;  %v624_v26 = vpop.f32.mrf.mxu1 }
 0x1f7 PF: > { %s479_s11 = sand.u32 1, %s842_s18   ;;  %p1103_p1 = scmp.ne.s32.totalorder %s1092_s25, 0 }
 0x1f8   : > { %p1104_p2 = scmp.ge.s32.totalorder %s854_s21, 2  ;;  %s480_s12 = scalar_lea.sflag [#allocation4], %s479_s11 }
 0x1fa   : > { %p649_p6 = pnand %p1104_p2, %p1103_p1 }
 0x1fc   : > { %p650_p12 = pneg %p649_p6 }
 0x1fe   : > { %837 = dma.done.wait (%p650_p12), %s480_s12, 128  }
 0x1ff   : > { %839 = vsyncadd (%p650_p12), %s480_s12, 4294967168  ;;  %p19_p7 = scmp.ge.s32.totalorder %s966_s15, 4   ;;  %s1105_s18 = smov %s846_s19 }
 0x200   : > { %s1106_s19 = smov %s850_s20  ;;  %s1107_s20 = smov %s982_s27 }
 0x201   : > { %s1108_s21 = smov %s966_s15  ;;  %21 = sbr.rel (!%p19_p7) target bundleno = 6 (0x6), region = 93 }
 0x206   :  { %485 = vsyncpa [#allocation3], 1 }
 0x207   :  { %487 = vsyncpa [#allocation3 + $0x1], 1 }
 0x208   :  { %488 = vsyncpa [#allocation6], 1 }
 0x209   :  { %489 = vsyncpa [#allocation4], 1 }
 0x20a   :  { %491 = vsyncpa [#allocation4 + $0x1], 1 }

</bundles_post_ra>
